<compile_context>
chip_gen: v7x
topology: tpu7x:2x2x1
jax: 0.10.0
libtpu: 0.0.40
codegen_flags: <defaults>
</compile_context>

<pallas_src>
import functools

import jax
import jax.numpy as jnp
import numpy as np
from jax.experimental import pallas as pl
from jax.experimental.pallas import tpu as pltpu


def _nonlocal_attn_kernel(x_ref, wqkv_ref, bqkv_ref, wout_ref, bout_ref,
                          p_ref,
                          theta_scr, phit_scr, g_scr, last_n_ref,
                          *, dim_inner):
    """Grid = (N, S // TQ).  Blocks: x (1, C, S) resident across q; p (1, C, TQ)."""
    n = pl.program_id(0)
    q = pl.program_id(1)
    ci = dim_inner
    tq = p_ref.shape[2]

    # ---- K/V phase: once per sample.  Guarded by (q == 0) OR (cached sample != n) so it
    # is correct under any per-core iteration order of the 'parallel' batch axis.
    @pl.when(jnp.logical_or(q == 0, last_n_ref[0] != n))
    def _compute_kv():
        x = x_ref[0]                                                       # (C, S)
        # Fused theta/phi/g 1x1x1 convolutions: one (3Ci, C) @ (C, S) MXU push.
        # dim_inner**-0.5 is pre-folded into the theta rows of wqkv / bqkv.
        qkv = jnp.dot(wqkv_ref[...], x,
                      preferred_element_type=jnp.float32) + bqkv_ref[...]  # (3Ci, S)
        theta_scr[...] = qkv[:ci, :]                                       # (Ci, S), pre-scaled
        phit_scr[...] = qkv[ci:2 * ci, :].T                                # (S, Ci): one transpose/sample
        g_scr[...] = qkv[2 * ci:, :].astype(jnp.bfloat16)                  # (Ci, S) bf16 for the MXU
        last_n_ref[0] = n

    # ---- Attention for this query tile (keys on sublanes, queries on lanes).
    start = q * tq
    if tq % 128 == 0:
        start = pl.multiple_of(start, 128)
    theta_q = theta_scr[:, pl.ds(start, tq)]                               # (Ci, TQ)

    # logits[k, t] = sum_ci phi[ci, k] * theta_scaled[ci, t]
    logits = jnp.dot(phit_scr[...], theta_q,
                     preferred_element_type=jnp.float32)                   # (S, TQ)
    m = jnp.max(logits, axis=0, keepdims=True)                             # (1, TQ)
    e = jnp.exp(logits - m)                                                # (S, TQ)
    s = jnp.sum(e, axis=0, keepdims=True)                                  # (1, TQ)

    # Normalization deferred past the second matmul; bf16 operands, f32 accumulation.
    tpg = jnp.dot(g_scr[...], e.astype(jnp.bfloat16),
                  preferred_element_type=jnp.float32)                      # (Ci, TQ)
    tpg = tpg * pl.reciprocal(s, approx=True)

    # conv_out (1x1x1): (C, Ci) @ (Ci, TQ) + bias, written lane-dense as (C, TQ).
    p_ref[0] = jnp.dot(wout_ref[...], tpg,
                       preferred_element_type=jnp.float32) + bout_ref[...]


def _bn_residual_kernel(x_ref, p_ref, scale_ref, shift_ref, y_ref):
    """y = x + batchnorm(p), BN folded into per-channel scale/shift.  Lane-dense in S."""
    y_ref[0] = x_ref[0] + p_ref[0] * scale_ref[...] + shift_ref[...]


def _pick_tile(s, max_tile=512):
    """Largest multiple-of-128 divisor of s not exceeding max_tile (or s if none exists)."""
    if s % 128 != 0:
        return s
    best = 128
    t = 128
    while t <= min(s, max_tile):
        if s % t == 0:
            best = t
        t += 128
    return best


def nonlocal_forward(x, params, *, norm_eps=1e-5, tq=None, ts=None):
    """Non-local block forward.  x: (N, C, T, H, W) float32 -> (N, C, T, H, W) float32."""
    N, C, T, H, W = x.shape
    Ci = params["w_theta"].shape[0]
    S = T * H * W

    # NCTHW flattens directly to (N, C, S): pure reshape, no HBM transpose.
    x_flat = x.reshape(N, C, S)

    # Fused QKV weights; fold the softmax dim_inner**-0.5 scale into the theta rows
    # (weights AND bias, so the logits are unchanged).
    sc = Ci ** -0.5
    w_qkv = jnp.concatenate(
        [params["w_theta"] * sc, params["w_phi"], params["w_g"]], axis=0)       # (3Ci, C)
    b_qkv = jnp.concatenate(
        [params["b_theta"] * sc, params["b_phi"], params["b_g"]], axis=0
    ).reshape(3 * Ci, 1)
    w_out = params["w_out"]                                                     # (C, Ci)
    b_out = params["b_out"].reshape(C, 1)

    tq = _pick_tile(S) if tq is None else tq
    if S % tq != 0 or (tq % 128 != 0 and tq != S):
        raise ValueError(f"tq={tq} must divide S={S} and be a multiple of 128 (or equal S)")
    n_q = S // tq

    # VMEM budget: double-buffered x / p blocks + weights + per-sample K/V scratch + logits.
    est = 4 * (2 * C * S + 2 * C * tq + 3 * Ci * C + 3 * Ci + C * Ci + C
               + 2 * Ci * S + S * Ci + 2 * S * tq) + 2 * Ci * S
    vmem_limit = int(min(max(1.5 * est, 32 * 1024 * 1024), 48 * 1024 * 1024))

    kvfull = lambda shape: pl.BlockSpec(shape, lambda n, q: (0,) * len(shape))

    p_flat = pl.pallas_call(
        functools.partial(_nonlocal_attn_kernel, dim_inner=Ci),
        out_shape=jax.ShapeDtypeStruct((N, C, S), jnp.float32),
        grid_spec=pltpu.PrefetchScalarGridSpec(
            num_scalar_prefetch=0,
            grid=(N, n_q),
            in_specs=[
                pl.BlockSpec((1, C, S), lambda n, q: (n, 0, 0)),   # resident across q tiles
                kvfull((3 * Ci, C)), kvfull((3 * Ci, 1)),
                kvfull((C, Ci)), kvfull((C, 1)),
            ],
            out_specs=pl.BlockSpec((1, C, tq), lambda n, q: (n, 0, q)),
            scratch_shapes=[
                pltpu.VMEM((Ci, S), jnp.float32),    # theta (pre-scaled)
                pltpu.VMEM((S, Ci), jnp.float32),    # phi^T
                pltpu.VMEM((Ci, S), jnp.bfloat16),   # g (bf16)
                pltpu.SMEM((1,), jnp.int32),         # sample index whose K/V scratch is valid
            ],
        ),
        compiler_params=pltpu.CompilerParams(
            dimension_semantics=("parallel", "arbitrary"),
            vmem_limit_bytes=vmem_limit,
        ),
    )(x_flat, w_qkv, b_qkv, w_out, b_out)

    # BatchNorm3d training-mode statistics (biased variance), computed outside the kernel in
    # a numerically stable two-pass form so the batch grid axis above stays 'parallel'.
    mean = jnp.mean(p_flat, axis=(0, 2))
    var = jnp.var(p_flat, axis=(0, 2))
    scale = params["bn_gamma"] * jax.lax.rsqrt(var + norm_eps)
    shift = params["bn_beta"] - mean * scale

    ts = _pick_tile(S) if ts is None else ts
    if S % ts != 0 or (ts % 128 != 0 and ts != S):
        raise ValueError(f"ts={ts} must divide S={S} and be a multiple of 128 (or equal S)")

    y_flat = pl.pallas_call(
        _bn_residual_kernel,
        out_shape=jax.ShapeDtypeStruct((N, C, S), jnp.float32),
        grid_spec=pltpu.PrefetchScalarGridSpec(
            num_scalar_prefetch=0,
            grid=(N, S // ts),
            in_specs=[
                pl.BlockSpec((1, C, ts), lambda n, k: (n, 0, k)),
                pl.BlockSpec((1, C, ts), lambda n, k: (n, 0, k)),
                pl.BlockSpec((C, 1), lambda n, k: (0, 0)),
                pl.BlockSpec((C, 1), lambda n, k: (0, 0)),
            ],
            out_specs=pl.BlockSpec((1, C, ts), lambda n, k: (n, 0, k)),
        ),
        input_output_aliases={1: 0},   # y overwrites p's HBM buffer
        compiler_params=pltpu.CompilerParams(
            dimension_semantics=("parallel", "parallel")),
    )(x_flat, p_flat, scale.reshape(C, 1), shift.reshape(C, 1))

    return y_flat.reshape(N, C, T, H, W)


def nonlocal_reference(x, params, *, norm_eps=1e-5):
    """Pure-JAX (f32) reference mirroring the PyTorch forward (softmax, no pooling)."""
    N, C, T, H, W = x.shape
    Ci = params["w_theta"].shape[0]

    def conv1(v, w, b):
        return jnp.einsum("ncthw,oc->nothw", v, w) + b[None, :, None, None, None]

    theta = conv1(x, params["w_theta"], params["b_theta"]).reshape(N, Ci, -1)
    phi = conv1(x, params["w_phi"], params["b_phi"]).reshape(N, Ci, -1)
    g = conv1(x, params["w_g"], params["b_g"]).reshape(N, Ci, -1)

    tp = jnp.einsum("nct,ncp->ntp", theta, phi) * (Ci ** -0.5)
    tp = jax.nn.softmax(tp, axis=2)
    tpg = jnp.einsum("ntg,ncg->nct", tp, g).reshape(N, Ci, T, H, W)

    p = conv1(tpg, params["w_out"], params["b_out"])
    mean = p.mean(axis=(0, 2, 3, 4))
    var = p.var(axis=(0, 2, 3, 4))  # biased, as used by training-mode BN
    p = (p - mean[None, :, None, None, None]) / jnp.sqrt(
        var[None, :, None, None, None] + norm_eps)
    p = p * params["bn_gamma"][None, :, None, None, None] + \
        params["bn_beta"][None, :, None, None, None]
    return x + p


if __name__ == "__main__":
    # dim=16, dim_inner=8, S = 4*8*8 = 256 -> two 128-wide query tiles with tq=128.
    N, C, Ci, T, H, W = 2, 16, 8, 4, 8, 8

    key = jax.random.PRNGKey(0)
    ks = jax.random.split(key, 11)
    ws = 0.35
    params = {
        "w_theta": ws * jax.random.normal(ks[0], (Ci, C), jnp.float32),
        "b_theta": 0.1 * jax.random.normal(ks[1], (Ci,), jnp.float32),
        "w_phi":   ws * jax.random.normal(ks[2], (Ci, C), jnp.float32),
        "b_phi":   0.1 * jax.random.normal(ks[3], (Ci,), jnp.float32),
        "w_g":     ws * jax.random.normal(ks[4], (Ci, C), jnp.float32),
        "b_g":     0.1 * jax.random.normal(ks[5], (Ci,), jnp.float32),
        "w_out":   ws * jax.random.normal(ks[6], (C, Ci), jnp.float32),
        "b_out":   0.1 * jax.random.normal(ks[7], (C,), jnp.float32),
        "bn_gamma": 1.0 + 0.1 * jax.random.normal(ks[8], (C,), jnp.float32),
        "bn_beta":  0.1 * jax.random.normal(ks[9], (C,), jnp.float32),
    }
    x = jax.random.normal(ks[10], (N, C, T, H, W), jnp.float32)

    fwd = jax.jit(functools.partial(nonlocal_forward, tq=128, ts=128))
    y = fwd(x, params)
    jax.block_until_ready(y)

    y_ref = nonlocal_reference(x, params)
    # Tolerance covers the bf16 attention-weights @ g matmul (f32 accumulation) feeding a
    # batch-norm that rescales by 1/std; all other arithmetic is f32.  Real bugs (wrong
    # transpose / softmax axis / tiling) produce O(1) errors and are still caught.
    np.testing.assert_allclose(np.asarray(y), np.asarray(y_ref), rtol=5e-2, atol=5e-2)

    # TODO(synk): MaxPool3d path (use_pool=True) and the 'dot_product' instantiation are not
    # implemented (module defaults are pool_size=None, instantiation='softmax').
    print("KERNEL_OK")
</pallas_src>

<mosaic_0001>
module attributes {stable_mosaic.version = 11 : i64} {
  func.func @_nonlocal_attn_kernel(%arg0: i32, %arg1: i32, %arg2: memref<1x16x256xf32, #tpu.memory_space<vmem>>, %arg3: memref<24x16xf32, #tpu.memory_space<vmem>>, %arg4: memref<24x1xf32, #tpu.memory_space<vmem>>, %arg5: memref<16x8xf32, #tpu.memory_space<vmem>>, %arg6: memref<16x1xf32, #tpu.memory_space<vmem>>, %arg7: memref<1x16x128xf32, #tpu.memory_space<vmem>>, %arg8: memref<8x256xf32, #tpu.memory_space<vmem>>, %arg9: memref<256x8xf32, #tpu.memory_space<vmem>>, %arg10: memref<8x256xbf16, #tpu.memory_space<vmem>>, %arg11: memref<1xi32, #tpu.memory_space<smem>>) attributes {dimension_semantics = [#tpu.dimension_semantics<parallel>, #tpu.dimension_semantics<arbitrary>], iteration_bounds = array<i64: 2, 2>, scalar_prefetch = 0 : i64, scratch_operands = 4 : i64, tpu.core_type = #tpu.core_type<tc>, window_params = [{transform_indices = @transform_0, window_bounds = array<i64: 1, 16, 256>}, {pipeline_mode = #tpu.pipeline_mode<synchronous>, transform_indices = @transform_1, window_bounds = array<i64: 24, 16>}, {pipeline_mode = #tpu.pipeline_mode<synchronous>, transform_indices = @transform_2, window_bounds = array<i64: 24, 1>}, {pipeline_mode = #tpu.pipeline_mode<synchronous>, transform_indices = @transform_3, window_bounds = array<i64: 16, 8>}, {pipeline_mode = #tpu.pipeline_mode<synchronous>, transform_indices = @transform_4, window_bounds = array<i64: 16, 1>}, {transform_indices = @transform_5, window_bounds = array<i64: 1, 16, 128>}]} {
    %c0_i32 = arith.constant 0 : i32
    %0 = arith.cmpi eq, %arg1, %c0_i32 : i32
    %c0 = arith.constant 0 : index
    %1 = memref.load %arg11[%c0] : memref<1xi32, #tpu.memory_space<smem>>
    %2 = arith.cmpi ne, %1, %arg0 : i32
    %3 = arith.ori %0, %2 : i1
    %4 = arith.extui %3 : i1 to i32
    %c0_i32_0 = arith.constant 0 : i32
    %5 = arith.cmpi ne, %4, %c0_i32_0 : i32
    scf.if %5 {
      %c0_17 = arith.constant 0 : index
      %c0_18 = arith.constant 0 : index
      %c0_19 = arith.constant 0 : index
      %33 = vector.load %arg2[%c0_17, %c0_18, %c0_19] : memref<1x16x256xf32, #tpu.memory_space<vmem>>, vector<1x16x256xf32>
      %34 = vector.shape_cast %33 : vector<1x16x256xf32> to vector<16x256xf32>
      %c0_20 = arith.constant 0 : index
      %c0_21 = arith.constant 0 : index
      %35 = vector.load %arg3[%c0_20, %c0_21] : memref<24x16xf32, #tpu.memory_space<vmem>>, vector<24x16xf32>
      %cst_22 = arith.constant dense<0.000000e+00> : vector<24x256xf32>
      %36 = tpu.matmul %35, %34, %cst_22 {dimension_numbers = #tpu.dot_dimension_numbers<[1], [0], [0], [1], [0, 0, 1, 1], [], []>} : vector<24x16xf32>, vector<16x256xf32>, vector<24x256xf32> -> vector<24x256xf32>
      %c0_23 = arith.constant 0 : index
      %c0_24 = arith.constant 0 : index
      %37 = vector.load %arg4[%c0_23, %c0_24] : memref<24x1xf32, #tpu.memory_space<vmem>>, vector<24x1xf32>
      %38 = vector.broadcast %37 : vector<24x1xf32> to vector<24x256xf32>
      %39 = arith.addf %36, %38 : vector<24x256xf32>
      %40 = vector.extract_strided_slice %39 {offsets = [0, 0], sizes = [8, 256], strides = [1, 1]} : vector<24x256xf32> to vector<8x256xf32>
      %c0_25 = arith.constant 0 : index
      %c0_26 = arith.constant 0 : index
      %41 = vector.load %arg8[%c0_25, %c0_26] : memref<8x256xf32, #tpu.memory_space<vmem>>, vector<8x256xf32>
      tpu.vector_store %arg8[%c0_25, %c0_26], %40 {strides = array<i32>} : memref<8x256xf32, #tpu.memory_space<vmem>>, vector<8x256xf32>,
      %42 = vector.extract_strided_slice %39 {offsets = [8, 0], sizes = [8, 256], strides = [1, 1]} : vector<24x256xf32> to vector<8x256xf32>
      %43 = tpu.transpose %42, [1, 0] : vector<8x256xf32> -> vector<256x8xf32>
      %c0_27 = arith.constant 0 : index
      %c0_28 = arith.constant 0 : index
      %44 = vector.load %arg9[%c0_27, %c0_28] : memref<256x8xf32, #tpu.memory_space<vmem>>, vector<256x8xf32>
      tpu.vector_store %arg9[%c0_27, %c0_28], %43 {strides = array<i32>} : memref<256x8xf32, #tpu.memory_space<vmem>>, vector<256x8xf32>,
      %45 = vector.extract_strided_slice %39 {offsets = [16, 0], sizes = [8, 256], strides = [1, 1]} : vector<24x256xf32> to vector<8x256xf32>
      %46 = arith.truncf %45 : vector<8x256xf32> to vector<8x256xbf16>
      %c0_29 = arith.constant 0 : index
      %c0_30 = arith.constant 0 : index
      %47 = vector.load %arg10[%c0_29, %c0_30] : memref<8x256xbf16, #tpu.memory_space<vmem>>, vector<8x256xbf16>
      tpu.vector_store %arg10[%c0_29, %c0_30], %46 {strides = array<i32>} : memref<8x256xbf16, #tpu.memory_space<vmem>>, vector<8x256xbf16>,
      %c0_31 = arith.constant 0 : index
      %48 = memref.load %arg11[%c0_31] : memref<1xi32, #tpu.memory_space<smem>>
      memref.store %arg0, %arg11[%c0_31] : memref<1xi32, #tpu.memory_space<smem>>
    } else {
    }
    %c128_i32 = arith.constant 128 : i32
    %6 = arith.muli %arg1, %c128_i32 : i32
    %7 = tpu.assume_multiple %6, 128 : i32
    %c0_1 = arith.constant 0 : index
    %8 = arith.index_cast %7 : i32 to index
    %9 = vector.load %arg8[%c0_1, %8] : memref<8x256xf32, #tpu.memory_space<vmem>>, vector<8x128xf32>
    %c0_2 = arith.constant 0 : index
    %c0_3 = arith.constant 0 : index
    %10 = vector.load %arg9[%c0_2, %c0_3] : memref<256x8xf32, #tpu.memory_space<vmem>>, vector<256x8xf32>
    %cst = arith.constant dense<0.000000e+00> : vector<256x128xf32>
    %11 = tpu.matmul %10, %9, %cst {dimension_numbers = #tpu.dot_dimension_numbers<[1], [0], [0], [1], [0, 0, 1, 1], [], []>} : vector<256x8xf32>, vector<8x128xf32>, vector<256x128xf32> -> vector<256x128xf32>
    %cst_4 = arith.constant dense<0xFF800000> : vector<128xf32>
    %12 = vector.multi_reduction <maximumf>, %11, %cst_4 [0] : vector<256x128xf32> to vector<128xf32>
    %13 = vector.shape_cast %12 : vector<128xf32> to vector<1x128xf32>
    %14 = vector.broadcast %13 : vector<1x128xf32> to vector<256x128xf32>
    %15 = arith.subf %11, %14 : vector<256x128xf32>
    %16 = math.exp %15 : vector<256x128xf32>
    %cst_5 = arith.constant dense<0.000000e+00> : vector<128xf32>
    %17 = vector.multi_reduction <add>, %16, %cst_5 [0] : vector<256x128xf32> to vector<128xf32>
    %18 = vector.shape_cast %17 : vector<128xf32> to vector<1x128xf32>
    %c0_6 = arith.constant 0 : index
    %c0_7 = arith.constant 0 : index
    %19 = vector.load %arg10[%c0_6, %c0_7] : memref<8x256xbf16, #tpu.memory_space<vmem>>, vector<8x256xbf16>
    %20 = arith.truncf %16 : vector<256x128xf32> to vector<256x128xbf16>
    %cst_8 = arith.constant dense<0.000000e+00> : vector<8x128xf32>
    %21 = tpu.matmul %19, %20, %cst_8 {dimension_numbers = #tpu.dot_dimension_numbers<[1], [0], [0], [1], [0, 0, 1, 1], [], []>} : vector<8x256xbf16>, vector<256x128xbf16>, vector<8x128xf32> -> vector<8x128xf32>
    %22 = tpu.reciprocal %18 {approx = true} : vector<1x128xf32> -> vector<1x128xf32>
    %23 = vector.broadcast %22 : vector<1x128xf32> to vector<8x128xf32>
    %24 = arith.mulf %21, %23 : vector<8x128xf32>
    %c0_9 = arith.constant 0 : index
    %c0_10 = arith.constant 0 : index
    %25 = vector.load %arg5[%c0_9, %c0_10] : memref<16x8xf32, #tpu.memory_space<vmem>>, vector<16x8xf32>
    %cst_11 = arith.constant dense<0.000000e+00> : vector<16x128xf32>
    %26 = tpu.matmul %25, %24, %cst_11 {dimension_numbers = #tpu.dot_dimension_numbers<[1], [0], [0], [1], [0, 0, 1, 1], [], []>} : vector<16x8xf32>, vector<8x128xf32>, vector<16x128xf32> -> vector<16x128xf32>
    %c0_12 = arith.constant 0 : index
    %c0_13 = arith.constant 0 : index
    %27 = vector.load %arg6[%c0_12, %c0_13] : memref<16x1xf32, #tpu.memory_space<vmem>>, vector<16x1xf32>
    %28 = vector.broadcast %27 : vector<16x1xf32> to vector<16x128xf32>
    %29 = arith.addf %26, %28 : vector<16x128xf32>
    %c0_14 = arith.constant 0 : index
    %c0_15 = arith.constant 0 : index
    %c0_16 = arith.constant 0 : index
    %30 = vector.load %arg7[%c0_14, %c0_15, %c0_16] : memref<1x16x128xf32, #tpu.memory_space<vmem>>, vector<1x16x128xf32>
    %31 = vector.shape_cast %30 : vector<1x16x128xf32> to vector<16x128xf32>
    %32 = vector.shape_cast %29 : vector<16x128xf32> to vector<1x16x128xf32>
    tpu.vector_store %arg7[%c0_14, %c0_15, %c0_16], %32 {strides = array<i32>} : memref<1x16x128xf32, #tpu.memory_space<vmem>>, vector<1x16x128xf32>,
    return
  }
  func.func @transform_0(%arg0: i32, %arg1: i32) -> (i32, i32, i32) {
    %c0_i32 = arith.constant 0 : i32
    %c0_i32_0 = arith.constant 0 : i32
    %c0_i32_1 = arith.constant 0 : i32
    return %arg0, %c0_i32, %c0_i32_0 : i32, i32, i32
  }
  func.func @transform_1(%arg0: i32, %arg1: i32) -> (i32, i32) {
    %c0_i32 = arith.constant 0 : i32
    %c0_i32_0 = arith.constant 0 : i32
    %c0_i32_1 = arith.constant 0 : i32
    return %c0_i32, %c0_i32_0 : i32, i32
  }
  func.func @transform_2(%arg0: i32, %arg1: i32) -> (i32, i32) {
    %c0_i32 = arith.constant 0 : i32
    %c0_i32_0 = arith.constant 0 : i32
    %c0_i32_1 = arith.constant 0 : i32
    return %c0_i32, %c0_i32_0 : i32, i32
  }
  func.func @transform_3(%arg0: i32, %arg1: i32) -> (i32, i32) {
    %c0_i32 = arith.constant 0 : i32
    %c0_i32_0 = arith.constant 0 : i32
    %c0_i32_1 = arith.constant 0 : i32
    return %c0_i32, %c0_i32_0 : i32, i32
  }
  func.func @transform_4(%arg0: i32, %arg1: i32) -> (i32, i32) {
    %c0_i32 = arith.constant 0 : i32
    %c0_i32_0 = arith.constant 0 : i32
    %c0_i32_1 = arith.constant 0 : i32
    return %c0_i32, %c0_i32_0 : i32, i32
  }
  func.func @transform_5(%arg0: i32, %arg1: i32) -> (i32, i32, i32) {
    %c0_i32 = arith.constant 0 : i32
    %c0_i32_0 = arith.constant 0 : i32
    return %arg0, %c0_i32, %arg1 : i32, i32, i32
  }
}

module attributes {stable_mosaic.version = 11 : i64} {
  func.func @_bn_residual_kernel(%arg0: i32, %arg1: i32, %arg2: memref<1x16x128xf32, #tpu.memory_space<vmem>>, %arg3: memref<1x16x128xf32, #tpu.memory_space<vmem>>, %arg4: memref<16x1xf32, #tpu.memory_space<vmem>>, %arg5: memref<16x1xf32, #tpu.memory_space<vmem>>, %arg6: memref<1x16x128xf32, #tpu.memory_space<vmem>>) attributes {dimension_semantics = [#tpu.dimension_semantics<parallel>, #tpu.dimension_semantics<parallel>], iteration_bounds = array<i64: 2, 2>, scalar_prefetch = 0 : i64, scratch_operands = 0 : i64, tpu.core_type = #tpu.core_type<tc>, window_params = [{transform_indices = @transform_0, window_bounds = array<i64: 1, 16, 128>}, {transform_indices = @transform_1, window_bounds = array<i64: 1, 16, 128>}, {pipeline_mode = #tpu.pipeline_mode<synchronous>, transform_indices = @transform_2, window_bounds = array<i64: 16, 1>}, {pipeline_mode = #tpu.pipeline_mode<synchronous>, transform_indices = @transform_3, window_bounds = array<i64: 16, 1>}, {transform_indices = @transform_4, window_bounds = array<i64: 1, 16, 128>}]} {
    %c0 = arith.constant 0 : index
    %c0_0 = arith.constant 0 : index
    %c0_1 = arith.constant 0 : index
    %0 = vector.load %arg2[%c0, %c0_0, %c0_1] : memref<1x16x128xf32, #tpu.memory_space<vmem>>, vector<1x16x128xf32>
    %1 = vector.shape_cast %0 : vector<1x16x128xf32> to vector<16x128xf32>
    %c0_2 = arith.constant 0 : index
    %c0_3 = arith.constant 0 : index
    %c0_4 = arith.constant 0 : index
    %2 = vector.load %arg3[%c0_2, %c0_3, %c0_4] : memref<1x16x128xf32, #tpu.memory_space<vmem>>, vector<1x16x128xf32>
    %3 = vector.shape_cast %2 : vector<1x16x128xf32> to vector<16x128xf32>
    %c0_5 = arith.constant 0 : index
    %c0_6 = arith.constant 0 : index
    %4 = vector.load %arg4[%c0_5, %c0_6] : memref<16x1xf32, #tpu.memory_space<vmem>>, vector<16x1xf32>
    %5 = vector.broadcast %4 : vector<16x1xf32> to vector<16x128xf32>
    %6 = arith.mulf %3, %5 : vector<16x128xf32>
    %7 = arith.addf %1, %6 : vector<16x128xf32>
    %c0_7 = arith.constant 0 : index
    %c0_8 = arith.constant 0 : index
    %8 = vector.load %arg5[%c0_7, %c0_8] : memref<16x1xf32, #tpu.memory_space<vmem>>, vector<16x1xf32>
    %9 = vector.broadcast %8 : vector<16x1xf32> to vector<16x128xf32>
    %10 = arith.addf %7, %9 : vector<16x128xf32>
    %c0_9 = arith.constant 0 : index
    %c0_10 = arith.constant 0 : index
    %c0_11 = arith.constant 0 : index
    %11 = vector.load %arg6[%c0_9, %c0_10, %c0_11] : memref<1x16x128xf32, #tpu.memory_space<vmem>>, vector<1x16x128xf32>
    %12 = vector.shape_cast %11 : vector<1x16x128xf32> to vector<16x128xf32>
    %13 = vector.shape_cast %10 : vector<16x128xf32> to vector<1x16x128xf32>
    tpu.vector_store %arg6[%c0_9, %c0_10, %c0_11], %13 {strides = array<i32>} : memref<1x16x128xf32, #tpu.memory_space<vmem>>, vector<1x16x128xf32>,
    return
  }
  func.func @transform_0(%arg0: i32, %arg1: i32) -> (i32, i32, i32) {
    %c0_i32 = arith.constant 0 : i32
    %c0_i32_0 = arith.constant 0 : i32
    return %arg0, %c0_i32, %arg1 : i32, i32, i32
  }
  func.func @transform_1(%arg0: i32, %arg1: i32) -> (i32, i32, i32) {
    %c0_i32 = arith.constant 0 : i32
    %c0_i32_0 = arith.constant 0 : i32
    return %arg0, %c0_i32, %arg1 : i32, i32, i32
  }
  func.func @transform_2(%arg0: i32, %arg1: i32) -> (i32, i32) {
    %c0_i32 = arith.constant 0 : i32
    %c0_i32_0 = arith.constant 0 : i32
    %c0_i32_1 = arith.constant 0 : i32
    return %c0_i32, %c0_i32_0 : i32, i32
  }
  func.func @transform_3(%arg0: i32, %arg1: i32) -> (i32, i32) {
    %c0_i32 = arith.constant 0 : i32
    %c0_i32_0 = arith.constant 0 : i32
    %c0_i32_1 = arith.constant 0 : i32
    return %c0_i32, %c0_i32_0 : i32, i32
  }
  func.func @transform_4(%arg0: i32, %arg1: i32) -> (i32, i32, i32) {
    %c0_i32 = arith.constant 0 : i32
    %c0_i32_0 = arith.constant 0 : i32
    return %arg0, %c0_i32, %arg1 : i32, i32, i32
  }
}

</mosaic_0001>

<bundles_post_ra>
// kernel: nonlocal_forward.3
= control target key start
LH: loop header
LB: loop body
LE: loop exit
PB: predicated region body
PF: predicated region fallthrough
CT: control target
= control target key end

     0   :  { %s645_s15 = smov 0   ;;  %s647_s16 = smov 0   ;;  %s767_s0 = inlined_call_operand.vmem [shape: f32[2,16,256], index: 0, kind: input, shape index: {}]   ;;  %s768_s1 = inlined_call_operand.vmem [shape: f32[2,16,256], index: 1, kind: input, shape index: {}, may-alias: {1,4}]   ;;  %s769_s2 = inlined_call_operand.vmem [shape: f32[16,1], index: 2, kind: input, shape index: {}]   ;;  %s770_s3 = inlined_call_operand.vmem [shape: f32[16,1], index: 3, kind: input, shape index: {}]   ;;  %s771_s4 = inlined_call_operand.vmem [shape: f32[2,16,256], index: 4, kind: output, shape index: {}, may-alias: {1,4}]  }
   0x1   :  { %s649_s17 = smov 0   ;;  %s651_s18 = smov 0  }
   0x2   :  { %s653_s19 = smov 0   ;;  %s655_s20 = smov 0  }
   0x3   :  { %s657_s21 = smov 0  }
   0x4 LB: > { %s23_s22 = sadd.s32 1, %s609_s19  ;;  %s26_s23 = sadd.s32 1, %s613_s20  ;;  %s617_s21 = sphi %s657_s21, %s14_s21   ;;  %s613_s20 = sphi %s655_s20, %s779_s20   ;;  %s609_s19 = sphi %s653_s19, %s778_s19   ;;  %s605_s18 = sphi %s651_s18, %s777_s18   ;;  %s601_s17 = sphi %s649_s17, %s776_s17   ;;  %s597_s16 = sphi %s647_s16, %s775_s16   ;;  %s593_s15 = sphi %s645_s15, %s774_s15  }
   0x5   : > { %p24_p0 = scmp.ge.s32.totalorder %s23_s22, 2  ;;  %s485_s24 = sadd.s32 4294967295, %s617_s21  }
   0x6   : > { %p42_p1 = scmp.ne.s32.totalorder %s597_s16, %s593_s15  ;;  %p43_p2 = scmp.eq.s32.totalorder %s617_s21, 0 }
   0x7   : > { %s781_s22 = smov (%p24_p0, %s23_s22), 0  ;;  %s783_s23 = smov (!%p24_p0, %s26_s23), %s613_s20 }
   0x8   : > { %p28_p3 = scmp.ge.s32.totalorder %s783_s23, 2  ;;  %p144_p4 = scmp.eq.s32.totalorder %s485_s24, 3 }
   0x9   : > { %s31_s25 = ssub.s32 %s609_s19, %s781_s22  ;;  %p691_p5 = por %p43_p2, %p42_p1 }
   0xa   : > { %s785_s23 = smov (%p28_p3, %s783_s23), 0  ;;  %p697_p6 = por %p144_p4, %p42_p1 }
   0xb   : > { %s30_s28 = ssub.s32 %s613_s20, %s785_s23  ;;  %s35_s30 = sadd.s32 1, %s597_s16 }
   0xc   : > { %s32_s29 = sor.u32 %s31_s25, %s30_s28  ;;  %p488_p8 = scmp.ge.s32.totalorder %s617_s21, 4 }
   0xd   : > { %p33_p7 = scmp.eq.s32.totalorder %s32_s29, 0 }
   0xe   : > { %172 = sbr.rel (%p488_p8) target bundleno = 35 (0x23), region = 24 }
   0xf   : > { %s705_s5 = scalar_select %p33_p7, %s597_s16, %s35_s30  }
  0x15   : > { %175 = sbr.rel (!%p691_p5) target bundleno = 28 (0x1c), region = 28  ;;  %s177_s6 = sand.u32 (%p691_p5), 1, %s597_s16  }
  0x16   : > { %s490_s7 = sshll.u32 (%p691_p5), %s613_s20, 2  ;;  %s489_s8 = sshll.u32 (%p691_p5), %s177_s6, 4 }
  0x17   : > { %s181_s9 = sadd.s32 (%p691_p5), %s609_s19, %s490_s7  ;;  %s179_s14 = scalar_lea.vmem (%p691_p5), [#allocation2], %s489_s8 }
  0x18   : > { %s491_s10 = sshll.u32 (%p691_p5), %s181_s9, 3 }
  0x19   : > { %s183_s13 = scalar_lea.vmem (%p691_p5), %s767_s0, %s491_s10 }
  0x1a   : > { %v213_v0 = vld [vmem:[%s183_s13] sm:$0xff] (%p691_p5)  ;;  %v215_v1 = vld [vmem:[%s183_s13 + $0x10] sm:$0xff] (%p691_p5) }
  0x1b   : > { %214 = vst [vmem:[%s179_s14] sm:$0xff] (%p691_p5), %v213_v0  ;;  %216 = vst [vmem:[%s179_s14 + $0x8] sm:$0xff] (%p691_p5), %v215_v1 }
  0x1c PF: > { %222 = sbr.rel (!%p691_p5) target bundleno = 35 (0x23), region = 66  ;;  %s224_s24 = sand.u32 (%p691_p5), 1, %s597_s16  }
  0x1d   : > { %s493_s25 = sshll.u32 (%p691_p5), %s613_s20, 2  ;;  %s492_s28 = sshll.u32 (%p691_p5), %s224_s24, 4 }
  0x1e   : > { %s228_s29 = sadd.s32 (%p691_p5), %s609_s19, %s493_s25  ;;  %s226_s8 = scalar_lea.vmem (%p691_p5), [#allocation3], %s492_s28 }
  0x1f   : > { %s494_s30 = sshll.u32 (%p691_p5), %s228_s29, 3 }
  0x20   : > { %s230_s9 = scalar_lea.vmem (%p691_p5), %s768_s1, %s494_s30 }
  0x21   : > { %v260_v2 = vld [vmem:[%s230_s9] sm:$0xff] (%p691_p5)  ;;  %v262_v3 = vld [vmem:[%s230_s9 + $0x10] sm:$0xff] (%p691_p5) }
  0x22   : > { %261 = vst [vmem:[%s226_s8] sm:$0xff] (%p691_p5), %v260_v2  ;;  %263 = vst [vmem:[%s226_s8 + $0x8] sm:$0xff] (%p691_p5), %v262_v3 }
  0x23 PF: > { %p495_p9 = scmp.ge.s32.totalorder %s617_s21, 1  ;;  %p268_p10 = scmp.lt.s32.totalorder %s617_s21, 5 }
  0x25   : > { %p269_p11 = pnand %p495_p9, %p268_p10 }
  0x26   : > { %v330_v4 = vld [vmem:[%s770_s3] sm:$0xff] (!%p269_p11)  ;;  %v619_v6 = vmov (!%p269_p11), 0   ;;  %v331_v7 = vld [vmem:[%s770_s3 + $0x8] sm:$0xff] (!%p269_p11)  ;;  %s275_s28 = sand.u32 (!%p269_p11), 1, %s593_s15  }
  0x27   : > { %272 = sbr.rel (%p269_p11) target bundleno = 187 (0xbb), region = 104  ;;  %v314_v5 = vld [vmem:[%s769_s2] sm:$0xff] (!%p269_p11)  ;;  %562 = vset.pattern.permute.xlu1 (!%p269_p11), %v619_v6  ;;  %561 = vset.pattern.permute.xlu0 (!%p269_p11), %v619_v6  ;;  %v315_v8 = vld [vmem:[%s769_s2 + $0x8] sm:$0xff] (!%p269_p11)  ;;  %s496_s29 = sshll.u32 (!%p269_p11), %s275_s28, 4 }
  0x28   : > { %334 = vperm.xlu1 (!%p269_p11), %562, %v330_v4   ;;  %318 = vperm.xlu0 (!%p269_p11), %561, %v314_v5   ;;  %s284_s30 = scalar_lea.vmem (!%p269_p11), [#allocation3], %s496_s29  ;;  %s277_s6 = scalar_lea.vmem (!%p269_p11), [#allocation2], %s496_s29 }
  0x29   : > { %v312_v9 = vld [vmem:[%s284_s30] sm:$0xff] (!%p269_p11)  ;;  %v313_v14 = vld [vmem:[%s284_s30 + $0x8] sm:$0xff] (!%p269_p11)  ;;  %s309_s7 = scalar_lea.vmem (!%p269_p11), [#allocation4], %s496_s29 }
  0x2a   : > { %v310_v11 = vld [vmem:[%s277_s6] sm:$0xff] (!%p269_p11)  ;;  %v311_v17 = vld [vmem:[%s277_s6 + $0x8] sm:$0xff] (!%p269_p11) }
  0x2c   : > { %339 = vperm.xlu1 (!%p269_p11), %562, %v331_v7   ;;  %323 = vperm.xlu0 (!%p269_p11), %561, %v315_v8  }
  0x2e   : > { %s500_s15 = sshll.u32 (%p697_p6), %s605_s18, 2 }
  0x2f   : > { %s354_s9 = sadd.s32 (%p697_p6), %s601_s17, %s500_s15 }
  0x30   : > { %s501_s8 = sshll.u32 (%p697_p6), %s354_s9, 3 }
  0x31   : > { %s356_s11 = scalar_lea.vmem (%p697_p6), %s771_s4, %s501_s8 }
  0xa7   : > { %v319_v10 = vpop.permute.xlu0 %318  ;;  %v335_v13 = vpop.permute.xlu1 %334 }
  0xa8   : > { %v326_v12 = vmul.f32 %v319_v10, %v312_v9 }
  0xaa   : > { %v328_v15 = vadd.f32 %v326_v12, %v310_v11 }
  0xab   : > { %v324_v16 = vpop.permute.xlu0 %323  ;;  %v340_v21 = vpop.permute.xlu1 %339 }
  0xac   : > { %v342_v18 = vadd.f32 %v335_v13, %v328_v15  ;;  %v327_v19 = vmul.f32 %v324_v16, %v313_v14  ;;  %352 = sbr.rel (!%p697_p6) target bundleno = 187 (0xbb), region = 116 }
  0xae   : > { %344 = vst [vmem:[%s309_s7] sm:$0xff] %v342_v18  ;;  %v329_v20 = vadd.f32 %v327_v19, %v311_v17 }
  0xb0   : > { %v343_v22 = vadd.f32 %v340_v21, %v329_v20 }
  0xb2   : > { %345 = vst [vmem:[%s309_s7 + $0x8] sm:$0xff] %v343_v22 }
  0xb5   : > { %v386_v23 = vld [vmem:[%s309_s7] sm:$0xff] }
  0xb6   : > { %387 = vst [vmem:[%s356_s11] sm:$0xff] %v386_v23 }
  0xb9   : > { %v388_v24 = vld [vmem:[%s309_s7 + $0x8] sm:$0xff] }
  0xba   : > { %389 = vst [vmem:[%s356_s11 + $0x10] sm:$0xff] %v388_v24 }
  0xbb PF: > { %s14_s21 = sadd.s32 1, %s617_s21   ;;  %s774_s15 = smov %s597_s16 }
  0xbc   : > { %p11_p12 = scmp.ge.s32.totalorder %s14_s21, 6   ;;  %s775_s16 = smov %s705_s5 }
  0xbd   : > { %s776_s17 = smov %s609_s19  ;;  %s777_s18 = smov %s613_s20 }
  0xbe   : > { %s778_s19 = smov %s781_s22  ;;  %s779_s20 = smov %s785_s23 }
  0xbf   :  { %13 = sbr.rel (!%p11_p12) target bundleno = 4 (0x4), region = 193 }

// kernel: nonlocal_forward.2
= control target key start
LH: loop header
LB: loop body
LE: loop exit
PB: predicated region body
PF: predicated region fallthrough
CT: control target
= control target key end

     0   :  { %s1670_s18 = smov 0   ;;  %s1672_s19 = smov 0   ;;  %s2155_s0 = inlined_call_operand.vmem [shape: f32[2,16,256], index: 0, kind: input, shape index: {}]   ;;  %s2156_s1 = inlined_call_operand.vmem [shape: f32[24,16], index: 1, kind: input, shape index: {}]   ;;  %s2157_s2 = inlined_call_operand.vmem [shape: f32[24,1], index: 2, kind: input, shape index: {}]   ;;  %s2158_s3 = inlined_call_operand.vmem [shape: f32[16,8], index: 3, kind: input, shape index: {}]   ;;  %s2159_s4 = inlined_call_operand.vmem [shape: f32[16,1], index: 4, kind: input, shape index: {}]   ;;  %s2160_s5 = inlined_call_operand.vmem [shape: f32[2,16,256], index: 5, kind: output, shape index: {}]  }
   0x1   :  { %s1674_s20 = smov 0   ;;  %s1676_s21 = smov 0  }
   0x2   :  { %s1678_s22 = smov 0   ;;  %s1680_s23 = smov 0  }
   0x3   :  { %s1682_s24 = smov 0  }
   0x4 LB: > { %s24_s25 = sadd.s32 1, %s1627_s22  ;;  %s27_s26 = sadd.s32 1, %s1631_s23  ;;  %s1635_s24 = sphi %s1682_s24, %s15_s24   ;;  %s1631_s23 = sphi %s1680_s23, %s2167_s23   ;;  %s1627_s22 = sphi %s1678_s22, %s2166_s22   ;;  %s1623_s21 = sphi %s1676_s21, %s2165_s21   ;;  %s1619_s20 = sphi %s1674_s20, %s2164_s20   ;;  %s1615_s19 = sphi %s1672_s19, %s2163_s19   ;;  %s1611_s18 = sphi %s1670_s18, %s2162_s18  }
   0x5   : > { %p25_p0 = scmp.ge.s32.totalorder %s24_s25, 2  ;;  %s1275_s27 = sadd.s32 4294967295, %s1635_s24  }
   0x6   : > { %p156_p1 = scmp.ne.s32.totalorder %s1615_s19, %s1611_s18  ;;  %p157_p2 = scmp.eq.s32.totalorder %s1275_s27, 3 }
   0x7   : > { %s2169_s25 = smov (%p25_p0, %s24_s25), 0  ;;  %s2171_s26 = smov (!%p25_p0, %s27_s26), %s1631_s23 }
   0x8   : > { %s142_s28 = ssub.s32 %s1627_s22, %s2169_s25  ;;  %p29_p3 = scmp.ge.s32.totalorder %s2171_s26, 2 }
   0x9   : > { %p1279_p4 = scmp.ge.s32.totalorder %s1635_s24, 1  ;;  %p1716_p5 = por %p157_p2, %p156_p1 }
   0xa   : > { %p201_p6 = scmp.lt.s32.totalorder %s1635_s24, 5  ;;  %s2173_s26 = smov (%p29_p3, %s2171_s26), 0 }
   0xb   : > { %s141_s30 = ssub.s32 %s1631_s23, %s2173_s26  ;;  %s146_s7 = sadd.s32 1, %s1615_s19 }
   0xc   : > { %p202_p7 = pnand %p1279_p4, %p201_p6  ;;  %s143_s6 = sor.u32 %s142_s28, %s141_s30 }
   0xd   : > { %p144_p8 = scmp.eq.s32.totalorder %s143_s6, 0  ;;  %s225_s9 = sand.u32 (!%p202_p7), 1, %s1611_s18  }
   0xe   : > { %205 = sbr.rel (%p202_p7) target bundleno = 1250 (0x4e2), region = 40  ;;  %p228_p9 = scmp.lt.s32.totalorder (!%p202_p7), %s1623_s21, 1 }
   0xf   : > { %s1727_s8 = scalar_select %p144_p8, %s1615_s19, %s146_s7  }
  0x10   : > { %s1280_s10 = sshll.u32 (!%p202_p7), %s225_s9, 4  ;;  %s235_s11 = sld [smem:[#allocation5]] (!%p202_p7) }
  0x11   : > { %p234_p10 = scmp.eq.s32.totalorder (!%p202_p7), %s1619_s20, 0  ;;  %s1737_s17 = scalar_lea.vmem (!%p202_p7), [#allocation6], %s1280_s10 }
  0x15   : > { %s229_s12 = scalar_select %p228_p9, %s1623_s21, 1 }
  0x16   : > { %p236_p11 = scmp.ne.s32.totalorder %s235_s11, %s1623_s21 }
  0x17   : > { %s1330_s13 = sshll.u32 %s229_s12, 5 }
  0x18   : > { %s232_s16 = scalar_lea.vmem %s2155_s0, %s1330_s13  ;;  %p237_p12 = por %p236_p11, %p234_p10 }
  0x19   : > { %v242_v0 = vld [vmem:[%s232_s16 + $0x8] sm:$0xff] (%p237_p12)  ;;  %v244_v1 = vld [vmem:[%s232_s16 + $0x18] sm:$0xff] (%p237_p12)  ;;  %v241_v2 = vld [vmem:[%s232_s16] sm:$0xff] (%p237_p12)  ;;  %v1637_v5 = vmov (%p237_p12), 0.0   ;;  %v1638_v6 = vmov (%p237_p12), 0   ;;  %468 = sst [smem:[#allocation5]] (%p237_p12), %s1623_s21 }
  0x1a   : > { %240 = sbr.rel (!%p237_p12) target bundleno = 437 (0x1b5), region = 44  ;;  %v1445_v3 = vpack.c.bf16 (%p237_p12), %v244_v1, %v242_v0  ;;  %v243_v4 = vld [vmem:[%s232_s16 + $0x10] sm:$0xff] (%p237_p12)  ;;  %346 = vmatprep.mubr.f32.mxu1 (%p237_p12), %v1637_v5  ;;  %1510 = vset.pattern.permute.xlu0 (%p237_p12), %v1638_v6  ;;  %v249_v8 = vld [vmem:[%s2157_s2 + $0x8] sm:$0xff] (%p237_p12)  ;;  %v248_v9 = vld [vmem:[%s2157_s2] sm:$0xff] (%p237_p12)  ;;  %vm266_vm0 = vcmask (%p237_p12), 130048   ;;  %vm425_vm1 = vcmask (%p237_p12), 64512  }
  0x1b   : > { %v1447_v7 = vpack.c.bf16 (%p237_p12), %v243_v4, %v241_v2  ;;  %340 = vmatprep.mubr.f32.mxu0 (%p237_p12), %v1637_v5  ;;  %1511 = vset.pattern.permute.xlu1 (%p237_p12), %v1638_v6  ;;  %v246_v10 = vld [vmem:[%s2156_s1 + $0x8] sm:$0xff] (%p237_p12)  ;;  %v250_v11 = vld [vmem:[%s2157_s2 + $0x10] sm:$0xff] (%p237_p12)  ;;  %v245_v12 = vld [vmem:[%s2156_s1] sm:$0xff] (%p237_p12) }
  0x1c   : > { %1449 = vmatprep.subr.bf16.mxu1 (%p237_p12), %v1445_v3  ;;  %258 = vperm.xlu0 (%p237_p12), %1510, %v249_v8   ;;  %v247_v13 = vld [vmem:[%s2156_s1 + $0x10] sm:$0xff] (%p237_p12) }
  0x1d   : > { %1450 = vmatpush1.bf16.msra.mxu1 (%p237_p12), %v1447_v7  ;;  %1446 = vmatprep.subr.bf16.mxu0 (%p237_p12), %v1445_v3 }
  0x1e   : > { %1448 = vmatpush1.bf16.msra.mxu0 (%p237_p12), %v1447_v7  ;;  %253 = vperm.xlu1 (%p237_p12), %1511, %v248_v9  }
  0x20   : > { %1284 = vmatmul.mubr.msk.f32.vlgmr.msra.gmra.mrb[0].mxu1 (%p237_p12), %vm266_vm0, %v246_v10  ;;  %263 = vperm.xlu0 (%p237_p12), %1510, %v250_v11  }
  0x21   : > { %352 = vmatprep.mubr.f32.mxu1 %v1637_v5  ;;  %1283 = vmatmul.mubr.msk.f32.vlgmr.msra.gmra.mrb[0].mxu0 %vm266_vm0, %v245_v12 }
  0x24   : > { %1285 = vmatmul.mubr.msk.f32.gmra.mrb[2].mxu1 %vm266_vm0, %v247_v13 }
  0x9b   : > { %v259_v14 = vpop.permute.xlu0 %258 }
  0x9d   : > { %v254_v15 = vpop.permute.xlu1 %253 }
  0x9f   : > { %v264_v24 = vpop.permute.xlu0 %263 }
  0xf3   : > { %v348_v16 = vpop.f32.mrb[0].mxu1 }
  0xf4   : > { %v349_v17 = vadd.f32 %v348_v16, %v259_v14  ;;  %v350_v18 = vpop.f32.mrb[1].mxu1  ;;  %v342_v19 = vpop.f32.mrb[0].mxu0 }
  0xf5   : > { %v351_v20 = vadd.f32 %v350_v18, %v259_v14  ;;  %v343_v21 = vadd.f32 %v342_v19, %v254_v15  ;;  %v344_v22 = vpop.f32.mrb[1].mxu0 }
  0xf6   : > { %361 = vxpose.xlu1.b32.start.end [1/1] (short) %v349_v17, 128  ;;  %v345_v23 = vadd.f32 %v344_v22, %v254_v15 }
  0xf7   : > { %v354_v25 = vpop.f32.mrb[2].mxu1  ;;  %393 = vxpose.xlu0.b32.start.end [1/1] (short) %v351_v20, 128  ;;  %359 = vst [vmem:[#allocation2] sm:$0xff] %v343_v21 }
  0xf8   : > { %v355_v26 = vadd.f32 %v354_v25, %v264_v24  ;;  %v356_v27 = vpop.f32.mrb[3].mxu1  ;;  %360 = vst [vmem:[#allocation2 + $0x8] sm:$0xff] %v345_v23 }
  0xf9   : > { %v357_v28 = vadd.f32 %v356_v27, %v264_v24 }
  0xfb   : > { %v1331_v29 = vpack.c.bf16 %v357_v28, %v355_v26 }
  0xfd   : > { %466 = vst [vmem:[#allocation4] sm:$0xff] %v1331_v29 }
 0x176   : > { %v377_v30 = vpop.trf.xlu1 }
 0x177   : > { %v409_v31 = vpop.trf.xlu0  ;;  %426 = vst.msk [vmem:[#allocation3] sm:$0xff] %vm425_vm1, %v377_v30 }
 0x178   : > { %442 = vst.msk [vmem:[#allocation3 + $0x80] sm:$0xff] %vm425_vm1, %v409_v31 }
 0x17a   : > { %v378_v32 = vpop.trf.xlu1 }
 0x17b   : > { %v410_v33 = vpop.trf.xlu0  ;;  %427 = vst.msk [vmem:[#allocation3 + $0x8] sm:$0xff] %vm425_vm1, %v378_v32 }
 0x17c   : > { %443 = vst.msk [vmem:[#allocation3 + $0x88] sm:$0xff] %vm425_vm1, %v410_v33 }
 0x17e   : > { %v379_v34 = vpop.trf.xlu1 }
 0x17f   : > { %v411_v35 = vpop.trf.xlu0  ;;  %428 = vst.msk [vmem:[#allocation3 + $0x10] sm:$0xff] %vm425_vm1, %v379_v34 }
 0x180   : > { %444 = vst.msk [vmem:[#allocation3 + $0x90] sm:$0xff] %vm425_vm1, %v411_v35 }
 0x182   : > { %v380_v36 = vpop.trf.xlu1 }
 0x183   : > { %v412_v37 = vpop.trf.xlu0  ;;  %429 = vst.msk [vmem:[#allocation3 + $0x18] sm:$0xff] %vm425_vm1, %v380_v36 }
 0x184   : > { %445 = vst.msk [vmem:[#allocation3 + $0x98] sm:$0xff] %vm425_vm1, %v412_v37 }
 0x186   : > { %v381_v38 = vpop.trf.xlu1 }
 0x187   : > { %v413_v39 = vpop.trf.xlu0  ;;  %430 = vst.msk [vmem:[#allocation3 + $0x20] sm:$0xff] %vm425_vm1, %v381_v38 }
 0x188   : > { %446 = vst.msk [vmem:[#allocation3 + $0xa0] sm:$0xff] %vm425_vm1, %v413_v39 }
 0x18a   : > { %v382_v40 = vpop.trf.xlu1 }
 0x18b   : > { %v414_v41 = vpop.trf.xlu0  ;;  %431 = vst.msk [vmem:[#allocation3 + $0x28] sm:$0xff] %vm425_vm1, %v382_v40 }
 0x18c   : > { %447 = vst.msk [vmem:[#allocation3 + $0xa8] sm:$0xff] %vm425_vm1, %v414_v41 }
 0x18e   : > { %v383_v42 = vpop.trf.xlu1 }
 0x18f   : > { %v415_v43 = vpop.trf.xlu0  ;;  %432 = vst.msk [vmem:[#allocation3 + $0x30] sm:$0xff] %vm425_vm1, %v383_v42 }
 0x190   : > { %448 = vst.msk [vmem:[#allocation3 + $0xb0] sm:$0xff] %vm425_vm1, %v415_v43 }
 0x192   : > { %v384_v44 = vpop.trf.xlu1 }
 0x193   : > { %v416_v45 = vpop.trf.xlu0  ;;  %433 = vst.msk [vmem:[#allocation3 + $0x38] sm:$0xff] %vm425_vm1, %v384_v44 }
 0x194   : > { %449 = vst.msk [vmem:[#allocation3 + $0xb8] sm:$0xff] %vm425_vm1, %v416_v45 }
 0x196   : > { %v385_v46 = vpop.trf.xlu1 }
 0x197   : > { %v417_v47 = vpop.trf.xlu0  ;;  %434 = vst.msk [vmem:[#allocation3 + $0x40] sm:$0xff] %vm425_vm1, %v385_v46 }
 0x198   : > { %450 = vst.msk [vmem:[#allocation3 + $0xc0] sm:$0xff] %vm425_vm1, %v417_v47 }
 0x19a   : > { %v386_v48 = vpop.trf.xlu1 }
 0x19b   : > { %v418_v49 = vpop.trf.xlu0  ;;  %435 = vst.msk [vmem:[#allocation3 + $0x48] sm:$0xff] %vm425_vm1, %v386_v48 }
 0x19c   : > { %451 = vst.msk [vmem:[#allocation3 + $0xc8] sm:$0xff] %vm425_vm1, %v418_v49 }
 0x19e   : > { %v387_v50 = vpop.trf.xlu1 }
 0x19f   : > { %v419_v51 = vpop.trf.xlu0  ;;  %436 = vst.msk [vmem:[#allocation3 + $0x50] sm:$0xff] %vm425_vm1, %v387_v50 }
 0x1a0   : > { %452 = vst.msk [vmem:[#allocation3 + $0xd0] sm:$0xff] %vm425_vm1, %v419_v51 }
 0x1a2   : > { %v388_v52 = vpop.trf.xlu1 }
 0x1a3   : > { %v420_v53 = vpop.trf.xlu0  ;;  %437 = vst.msk [vmem:[#allocation3 + $0x58] sm:$0xff] %vm425_vm1, %v388_v52 }
 0x1a4   : > { %453 = vst.msk [vmem:[#allocation3 + $0xd8] sm:$0xff] %vm425_vm1, %v420_v53 }
 0x1a6   : > { %v389_v54 = vpop.trf.xlu1 }
 0x1a7   : > { %v421_v55 = vpop.trf.xlu0  ;;  %438 = vst.msk [vmem:[#allocation3 + $0x60] sm:$0xff] %vm425_vm1, %v389_v54 }
 0x1a8   : > { %454 = vst.msk [vmem:[#allocation3 + $0xe0] sm:$0xff] %vm425_vm1, %v421_v55 }
 0x1aa   : > { %v390_v56 = vpop.trf.xlu1 }
 0x1ab   : > { %v422_v57 = vpop.trf.xlu0  ;;  %439 = vst.msk [vmem:[#allocation3 + $0x68] sm:$0xff] %vm425_vm1, %v390_v56 }
 0x1ac   : > { %455 = vst.msk [vmem:[#allocation3 + $0xe8] sm:$0xff] %vm425_vm1, %v422_v57 }
 0x1ae   : > { %v391_v58 = vpop.trf.xlu1 }
 0x1af   : > { %v423_v59 = vpop.trf.xlu0  ;;  %440 = vst.msk [vmem:[#allocation3 + $0x70] sm:$0xff] %vm425_vm1, %v391_v58 }
 0x1b0   : > { %456 = vst.msk [vmem:[#allocation3 + $0xf0] sm:$0xff] %vm425_vm1, %v423_v59 }
 0x1b2   : > { %v392_v60 = vpop.trf.xlu1 }
 0x1b3   : > { %v424_v61 = vpop.trf.xlu0  ;;  %441 = vst.msk [vmem:[#allocation3 + $0x78] sm:$0xff] %vm425_vm1, %v392_v60 }
 0x1b4   : > { %457 = vst.msk [vmem:[#allocation3 + $0xf8] sm:$0xff] %vm425_vm1, %v424_v61 }
 0x1b5 PF: > { %s1287_s15 = sshll.u32 %s1619_s20, 7  ;;  %v475_v62 = vld [vmem:[#allocation3] sm:$0xff]  ;;  %vm507_vm2 = vcmask 64512   ;;  %v476_v0 = vld [vmem:[#allocation3 + $0x8] sm:$0xff]  ;;  %v477_v1 = vld [vmem:[#allocation3 + $0x10] sm:$0xff]  ;;  %s1326_s13 = sshll.u32 (%p1716_p5), %s1623_s21, 2 }
 0x1b6   : > { %s470_s16 = sshra.s32 %s1287_s15, 7  ;;  %1392 = vmatprep.mubr.msk.f32.mxu0 %vm507_vm2, %v475_v62  ;;  %v478_v2 = vld [vmem:[#allocation3 + $0x18] sm:$0xff]  ;;  %v479_v3 = vld [vmem:[#allocation3 + $0x20] sm:$0xff]  ;;  %v480_v4 = vld [vmem:[#allocation3 + $0x28] sm:$0xff]  ;;  %s1170_s14 = sadd.s32 (%p1716_p5), %s1619_s20, %s1326_s13 }
 0x1b7   : > { %s1288_s18 = sshll.u32 %s470_s16, 3  ;;  %v481_v5 = vld [vmem:[#allocation3 + $0x30] sm:$0xff]  ;;  %v482_v6 = vld [vmem:[#allocation3 + $0x38] sm:$0xff]  ;;  %v483_v7 = vld [vmem:[#allocation3 + $0x40] sm:$0xff]  ;;  %s1327_s15 = sshll.u32 (%p1716_p5), %s1170_s14, 3 }
 0x1b8   : > { %s473_s27 = scalar_lea.vmem [#allocation2], %s1288_s18  ;;  %v484_v8 = vld [vmem:[#allocation3 + $0x48] sm:$0xff]  ;;  %v485_v9 = vld [vmem:[#allocation3 + $0x50] sm:$0xff]  ;;  %v486_v10 = vld [vmem:[#allocation3 + $0x58] sm:$0xff] }
 0x1b9   : > { %v474_v63 = vld [vmem:[%s473_s27] sm:$0xff]  ;;  %v487_v11 = vld [vmem:[#allocation3 + $0x60] sm:$0xff]  ;;  %v488_v12 = vld [vmem:[#allocation3 + $0x68] sm:$0xff]  ;;  %s1172_s27 = scalar_lea.vmem (%p1716_p5), %s2160_s5, %s1327_s15 }
 0x1ba   : > { %1390 = vmatprep.subr.mxu0 %v474_v63  ;;  %v489_v13 = vld [vmem:[#allocation3 + $0x70] sm:$0xff]  ;;  %v490_v14 = vld [vmem:[#allocation3 + $0x78] sm:$0xff]  ;;  %v491_v15 = vld [vmem:[#allocation3 + $0x80] sm:$0xff] }
 0x1bb   : > { %1391 = vmatpush3.msra.mxu0 %v474_v63  ;;  %v492_v16 = vld [vmem:[#allocation3 + $0x88] sm:$0xff]  ;;  %v493_v17 = vld [vmem:[#allocation3 + $0x90] sm:$0xff]  ;;  %v494_v18 = vld [vmem:[#allocation3 + $0x98] sm:$0xff] }
 0x1bc   : > { %1393 = vmatmul.mubr.msk.f32.vlgmr.msra.gmra.mrb[0].mxu0 %vm507_vm2, %v476_v0  ;;  %v495_v19 = vld [vmem:[#allocation3 + $0xa0] sm:$0xff]  ;;  %v496_v20 = vld [vmem:[#allocation3 + $0xa8] sm:$0xff]  ;;  %v497_v21 = vld [vmem:[#allocation3 + $0xb0] sm:$0xff] }
 0x1bd   : > { %1395 = vmatprep.mubr.msk.f32.mxu0 %vm507_vm2, %v477_v1  ;;  %v498_v22 = vld [vmem:[#allocation3 + $0xb8] sm:$0xff]  ;;  %v499_v23 = vld [vmem:[#allocation3 + $0xc0] sm:$0xff]  ;;  %v500_v24 = vld [vmem:[#allocation3 + $0xc8] sm:$0xff] }
 0x1be   : > { %v501_v25 = vld [vmem:[#allocation3 + $0xd0] sm:$0xff]  ;;  %v502_v26 = vld [vmem:[#allocation3 + $0xd8] sm:$0xff]  ;;  %v503_v27 = vld [vmem:[#allocation3 + $0xe0] sm:$0xff] }
 0x1bf   : > { %v504_v28 = vld [vmem:[#allocation3 + $0xe8] sm:$0xff]  ;;  %v505_v29 = vld [vmem:[#allocation3 + $0xf0] sm:$0xff]  ;;  %v506_v30 = vld [vmem:[#allocation3 + $0xf8] sm:$0xff] }
 0x1c0   : > { %1396 = vmatmul.mubr.msk.f32.gmra.mrb[2].mxu0 %vm507_vm2, %v478_v2  ;;  %v1877_v63 = vld [vmem:[#allocation4] sm:$0xff] }
 0x1c1   : > { %1398 = vmatprep.mubr.msk.f32.mxu0 %vm507_vm2, %v479_v3  ;;  %v1322_v0 = vcombine.high %v1877_v63, %v1877_v63 }
 0x1c3   : > { %1055 = vmatprep.mubr.bf16.mxu1 %v1322_v0 }
 0x1c4   : > { %1399 = vmatmul.mubr.msk.f32.gmra.mrb[4].mxu0 %vm507_vm2, %v480_v4 }
 0x1c5   : > { %1401 = vmatprep.mubr.msk.f32.mxu0 %vm507_vm2, %v481_v5 }
 0x1c8   : > { %1402 = vmatmul.mubr.msk.f32.gmra.mrb[6].mxu0 %vm507_vm2, %v482_v6 }
 0x1c9   : > { %1404 = vmatprep.mubr.msk.f32.mxu0 %vm507_vm2, %v483_v7 }
 0x1cc   : > { %1405 = vmatmul.mubr.msk.f32.gmra.mrb[8].mxu0 %vm507_vm2, %v484_v8 }
 0x1cd   : > { %1407 = vmatprep.mubr.msk.f32.mxu0 %vm507_vm2, %v485_v9 }
 0x1d0   : > { %1408 = vmatmul.mubr.msk.f32.gmra.mrb[10].mxu0 %vm507_vm2, %v486_v10 }
 0x1d1   : > { %1410 = vmatprep.mubr.msk.f32.mxu0 %vm507_vm2, %v487_v11 }
 0x1d4   : > { %1411 = vmatmul.mubr.msk.f32.gmra.mrb[12].mxu0 %vm507_vm2, %v488_v12 }
 0x1d5   : > { %1413 = vmatprep.mubr.msk.f32.mxu0 %vm507_vm2, %v489_v13 }
 0x1d8   : > { %1414 = vmatmul.mubr.msk.f32.gmra.mrb[14].mxu0 %vm507_vm2, %v490_v14 }
 0x1d9   : > { %1416 = vmatprep.mubr.msk.f32.mxu0 %vm507_vm2, %v491_v15 }
 0x1dc   : > { %1417 = vmatmul.mubr.msk.f32.gmra.mrb[16].mxu0 %vm507_vm2, %v492_v16 }
 0x1dd   : > { %1419 = vmatprep.mubr.msk.f32.mxu0 %vm507_vm2, %v493_v17 }
 0x1e0   : > { %1420 = vmatmul.mubr.msk.f32.gmra.mrb[18].mxu0 %vm507_vm2, %v494_v18 }
 0x1e1   : > { %1422 = vmatprep.mubr.msk.f32.mxu0 %vm507_vm2, %v495_v19 }
 0x1e4   : > { %1423 = vmatmul.mubr.msk.f32.gmra.mrb[20].mxu0 %vm507_vm2, %v496_v20 }
 0x1e5   : > { %1425 = vmatprep.mubr.msk.f32.mxu0 %vm507_vm2, %v497_v21 }
 0x1e8   : > { %1426 = vmatmul.mubr.msk.f32.gmra.mrb[22].mxu0 %vm507_vm2, %v498_v22 }
 0x1e9   : > { %1428 = vmatprep.mubr.msk.f32.mxu0 %vm507_vm2, %v499_v23 }
 0x1ec   : > { %1429 = vmatmul.mubr.msk.f32.gmra.mrb[24].mxu0 %vm507_vm2, %v500_v24 }
 0x1ed   : > { %1431 = vmatprep.mubr.msk.f32.mxu0 %vm507_vm2, %v501_v25 }
 0x1f0   : > { %1432 = vmatmul.mubr.msk.f32.gmra.mrb[26].mxu0 %vm507_vm2, %v502_v26 }
 0x1f1   : > { %1434 = vmatprep.mubr.msk.f32.mxu0 %vm507_vm2, %v503_v27 }
 0x1f4   : > { %1435 = vmatmul.mubr.msk.f32.gmra.mrb[28].mxu0 %vm507_vm2, %v504_v28 }
 0x1f5   : > { %1437 = vmatprep.mubr.msk.f32.mxu0 %vm507_vm2, %v505_v29 }
 0x1f8   : > { %1438 = vmatmul.mubr.msk.f32.gmra.mrb[30].mxu0 %vm507_vm2, %v506_v30 }
 0x28f   : > { %v1823_v31 = vpop.f32.mrb[0].mxu0 }
 0x290   : > { %v1825_v32 = vpop.f32.mrb[1].mxu0 }
 0x293   : > { %v1827_v33 = vpop.f32.mrb[2].mxu0 }
 0x294   : > { %v1829_v34 = vpop.f32.mrb[3].mxu0 }
 0x297   : > { %v1831_v35 = vpop.f32.mrb[4].mxu0 }
 0x298   : > { %v830_v36 = vmax.f32 %v1823_v31, %v1831_v35  ;;  %v1835_v37 = vpop.f32.mrb[5].mxu0 }
 0x299   : > { %v829_v38 = vmax.f32 %v1825_v32, %v1835_v37 }
 0x29b   : > { %v1839_v39 = vpop.f32.mrb[6].mxu0 }
 0x29c   : > { %v832_v40 = vmax.f32 %v1827_v33, %v1839_v39  ;;  %v1843_v41 = vpop.f32.mrb[7].mxu0 }
 0x29d   : > { %v831_v42 = vmax.f32 %v1829_v34, %v1843_v41 }
 0x29f   : > { %v1847_v43 = vpop.f32.mrb[8].mxu0 }
 0x2a0   : > { %v834_v44 = vmax.f32 %v830_v36, %v1847_v43  ;;  %v1850_v45 = vpop.f32.mrb[9].mxu0 }
 0x2a1   : > { %v833_v46 = vmax.f32 %v829_v38, %v1850_v45 }
 0x2a3   : > { %v1853_v47 = vpop.f32.mrb[10].mxu0 }
 0x2a4   : > { %v836_v48 = vmax.f32 %v832_v40, %v1853_v47  ;;  %v1856_v49 = vpop.f32.mrb[11].mxu0 }
 0x2a5   : > { %v835_v50 = vmax.f32 %v831_v42, %v1856_v49 }
 0x2a7   : > { %v1859_v51 = vpop.f32.mrb[12].mxu0 }
 0x2a8   : > { %v838_v52 = vmax.f32 %v834_v44, %v1859_v51  ;;  %v1862_v53 = vpop.f32.mrb[13].mxu0 }
 0x2a9   : > { %v837_v54 = vmax.f32 %v833_v46, %v1862_v53 }
 0x2ab   : > { %v1865_v55 = vpop.f32.mrb[14].mxu0 }
 0x2ac   : > { %v840_v56 = vmax.f32 %v836_v48, %v1865_v55  ;;  %v1868_v57 = vpop.f32.mrb[15].mxu0 }
 0x2ad   : > { %v839_v58 = vmax.f32 %v835_v50, %v1868_v57 }
 0x2af   : > { %v1871_v59 = vpop.f32.mrb[16].mxu0 }
 0x2b0   : > { %v842_v60 = vmax.f32 %v838_v52, %v1871_v59  ;;  %v1874_v61 = vpop.f32.mrb[17].mxu0 }
 0x2b1   : > { %v841_v62 = vmax.f32 %v837_v54, %v1874_v61 }
 0x2b3   : > { %v1881_v1 = vpop.f32.mrb[18].mxu0 }
 0x2b4   : > { %v844_v2 = vmax.f32 %v840_v56, %v1881_v1  ;;  %v1884_v3 = vpop.f32.mrb[19].mxu0 }
 0x2b5   : > { %v843_v4 = vmax.f32 %v839_v58, %v1884_v3 }
 0x2b7   : > { %v1887_v5 = vpop.f32.mrb[20].mxu0 }
 0x2b8   : > { %v846_v6 = vmax.f32 %v842_v60, %v1887_v5  ;;  %v1890_v7 = vpop.f32.mrb[21].mxu0 }
 0x2b9   : > { %v845_v8 = vmax.f32 %v841_v62, %v1890_v7 }
 0x2bb   : > { %v1893_v9 = vpop.f32.mrb[22].mxu0 }
 0x2bc   : > { %v848_v10 = vmax.f32 %v844_v2, %v1893_v9  ;;  %v1896_v11 = vpop.f32.mrb[23].mxu0 }
 0x2bd   : > { %v847_v12 = vmax.f32 %v843_v4, %v1896_v11 }
 0x2bf   : > { %v1899_v13 = vpop.f32.mrb[24].mxu0 }
 0x2c0   : > { %v850_v14 = vmax.f32 %v846_v6, %v1899_v13  ;;  %v1902_v15 = vpop.f32.mrb[25].mxu0 }
 0x2c1   : > { %v849_v16 = vmax.f32 %v845_v8, %v1902_v15 }
 0x2c3   : > { %v1905_v17 = vpop.f32.mrb[26].mxu0 }
 0x2c4   : > { %v852_v18 = vmax.f32 %v848_v10, %v1905_v17  ;;  %v1908_v19 = vpop.f32.mrb[27].mxu0 }
 0x2c5   : > { %v851_v20 = vmax.f32 %v847_v12, %v1908_v19 }
 0x2c7   : > { %v1911_v21 = vpop.f32.mrb[28].mxu0 }
 0x2c8   : > { %v854_v22 = vmax.f32 %v850_v14, %v1911_v21  ;;  %v1914_v23 = vpop.f32.mrb[29].mxu0 }
 0x2c9   : > { %v853_v24 = vmax.f32 %v849_v16, %v1914_v23 }
 0x2cb   : > { %v857_v25 = vmax.f32 %v853_v24, %v854_v22  ;;  %v1917_v26 = vpop.f32.mrb[30].mxu0 }
 0x2cc   : > { %v856_v27 = vmax.f32 %v852_v18, %v1917_v26  ;;  %v1920_v28 = vpop.f32.mrb[31].mxu0 }
 0x2cd   : > { %v855_v29 = vmax.f32 %v851_v20, %v1920_v28 }
 0x2cf   : > { %v858_v30 = vmax.f32 %v855_v29, %v856_v27 }
 0x2d1   : > { %v859_v36 = vmax.f32 %v857_v25, %v858_v30 }
 0x2d3   : > { %v860_v38 = vrot.slane %v859_v36, 4 }
 0x2d5   : > { %v861_v40 = vmax.f32 %v859_v36, %v860_v38 }
 0x2d7   : > { %v862_v42 = vrot.slane %v861_v40, 2 }
 0x2d9   : > { %v863_v44 = vmax.f32 %v861_v40, %v862_v42 }
 0x2db   : > { %v864_v46 = vrot.slane %v863_v44, 1 }
 0x2dd   : > { %v1923_v48 = vmax.f32 %v863_v44, %v864_v46 }
 0x2df   : > { %v866_v50 = vsub.f32 %v1825_v32, %v1923_v48  ;;  %v867_v52 = vsub.f32 %v1823_v31, %v1923_v48  ;;  %v868_v54 = vsub.f32 %v1829_v34, %v1923_v48  ;;  %v869_v56 = vsub.f32 %v1827_v33, %v1923_v48 }
 0x2e0   : > { %v870_v58 = vsub.f32 %v1835_v37, %v1923_v48  ;;  %v871_v60 = vsub.f32 %v1831_v35, %v1923_v48  ;;  %v872_v62 = vsub.f32 %v1843_v41, %v1923_v48  ;;  %v873_v32 = vsub.f32 %v1839_v39, %v1923_v48 }
 0x2e1   : > { %v874_v31 = vsub.f32 %v1850_v45, %v1923_v48  ;;  %v875_v34 = vsub.f32 %v1847_v43, %v1923_v48  ;;  %v876_v33 = vsub.f32 %v1856_v49, %v1923_v48  ;;  %v877_v37 = vsub.f32 %v1853_v47, %v1923_v48 }
 0x2e2   : > { %v878_v35 = vsub.f32 %v1862_v53, %v1923_v48  ;;  %v879_v41 = vsub.f32 %v1859_v51, %v1923_v48  ;;  %v880_v39 = vsub.f32 %v1868_v57, %v1923_v48  ;;  %v881_v45 = vsub.f32 %v1865_v55, %v1923_v48 }
 0x2e3   : > { %v882_v43 = vsub.f32 %v1874_v61, %v1923_v48  ;;  %v883_v49 = vsub.f32 %v1871_v59, %v1923_v48  ;;  %v884_v47 = vsub.f32 %v1884_v3, %v1923_v48  ;;  %v885_v53 = vsub.f32 %v1881_v1, %v1923_v48 }
 0x2e4   : > { %v886_v51 = vsub.f32 %v1890_v7, %v1923_v48  ;;  %v887_v57 = vsub.f32 %v1887_v5, %v1923_v48  ;;  %v888_v55 = vsub.f32 %v1896_v11, %v1923_v48  ;;  %v889_v61 = vsub.f32 %v1893_v9, %v1923_v48 }
 0x2e5   : > { %v890_v59 = vsub.f32 %v1902_v15, %v1923_v48  ;;  %v891_v0 = vsub.f32 %v1899_v13, %v1923_v48  ;;  %v892_v1 = vsub.f32 %v1908_v19, %v1923_v48  ;;  %v893_v2 = vsub.f32 %v1905_v17, %v1923_v48 }
 0x2e6   : > { %v894_v3 = vsub.f32 %v1914_v23, %v1923_v48  ;;  %v895_v4 = vsub.f32 %v1911_v21, %v1923_v48  ;;  %v896_v6 = vsub.f32 %v1920_v28, %v1923_v48  ;;  %v897_v7 = vsub.f32 %v1917_v26, %v1923_v48 }
 0x2e7   : > { %v898_v8 = vmul.f32 1.442695, %v866_v50  ;;  %v900_v10 = vmul.f32 1.442695, %v867_v52  ;;  %v902_v12 = vmul.f32 1.442695, %v868_v54 }
 0x2e8   : > { %v904_v14 = vmul.f32 1.442695, %v869_v56  ;;  %v906_v16 = vmul.f32 1.442695, %v870_v58  ;;  %v908_v18 = vmul.f32 1.442695, %v871_v60 }
 0x2e9   : > { %1515 = vpow2.f32 %v898_v8  ;;  %v910_v20 = vmul.f32 1.442695, %v872_v62  ;;  %v912_v22 = vmul.f32 1.442695, %v873_v32  ;;  %v914_v24 = vmul.f32 1.442695, %v874_v31 }
 0x2ea   : > { %1517 = vpow2.f32 %v900_v10  ;;  %v916_v25 = vmul.f32 1.442695, %v875_v34  ;;  %v918_v27 = vmul.f32 1.442695, %v876_v33  ;;  %v920_v29 = vmul.f32 1.442695, %v877_v37 }
 0x2eb   : > { %1519 = vpow2.f32 %v902_v12  ;;  %v922_v30 = vmul.f32 1.442695, %v878_v35  ;;  %v924_v36 = vmul.f32 1.442695, %v879_v41  ;;  %v926_v40 = vmul.f32 1.442695, %v880_v39 }
 0x2ec   : > { %1521 = vpow2.f32 %v904_v14  ;;  %v928_v44 = vmul.f32 1.442695, %v881_v45  ;;  %v930_v50 = vmul.f32 1.442695, %v882_v43  ;;  %v932_v58 = vmul.f32 1.442695, %v883_v49 }
 0x2ed   : > { %1523 = vpow2.f32 %v906_v16  ;;  %v934_v62 = vmul.f32 1.442695, %v884_v47  ;;  %v936_v33 = vmul.f32 1.442695, %v885_v53  ;;  %v938_v35 = vmul.f32 1.442695, %v886_v51 }
 0x2ee   : > { %1525 = vpow2.f32 %v908_v18  ;;  %v940_v43 = vmul.f32 1.442695, %v887_v57  ;;  %v942_v47 = vmul.f32 1.442695, %v888_v55  ;;  %v944_v5 = vmul.f32 1.442695, %v889_v61 }
 0x2ef   : > { %1527 = vpow2.f32 %v910_v20  ;;  %v946_v11 = vmul.f32 1.442695, %v890_v59  ;;  %v948_v9 = vmul.f32 1.442695, %v891_v0  ;;  %v950_v15 = vmul.f32 1.442695, %v892_v1 }
 0x2f0   : > { %1529 = vpow2.f32 %v912_v22  ;;  %v952_v13 = vmul.f32 1.442695, %v893_v2  ;;  %v954_v19 = vmul.f32 1.442695, %v894_v3  ;;  %v956_v17 = vmul.f32 1.442695, %v895_v4 }
 0x2f1   : > { %1531 = vpow2.f32 %v914_v24  ;;  %v958_v22 = vmul.f32 1.442695, %v896_v6 }
 0x2f2   : > { %1533 = vpow2.f32 %v916_v25  ;;  %v960_v25 = vmul.f32 1.442695, %v897_v7 }
 0x2f3   : > { %v1989_v38 = vpop.eup %1515  ;;  %1535 = vpow2.f32 %v918_v27 }
 0x2f4   : > { %v1991_v42 = vpop.eup %1517  ;;  %1537 = vpow2.f32 %v920_v29 }
 0x2f5   : > { %v1993_v46 = vpop.eup %1519  ;;  %1539 = vpow2.f32 %v922_v30  ;;  %v962_v52 = vadd.f32 %v1991_v42, %v1989_v38  ;;  %v1000_v54 = vpack.c.bf16 %v1991_v42, %v1989_v38 }
 0x2f6   : > { %v1999_v56 = vpop.eup %1521  ;;  %1541 = vpow2.f32 %v924_v36 }
 0x2f7   : > { %v2001_v60 = vpop.eup %1523  ;;  %1543 = vpow2.f32 %v926_v40  ;;  %v963_v32 = vadd.f32 %v1993_v46, %v962_v52  ;;  %v1001_v31 = vpack.c.bf16 %v1999_v56, %v1993_v46 }
 0x2f8   : > { %v2006_v34 = vpop.eup %1525  ;;  %1545 = vpow2.f32 %v928_v44 }
 0x2f9   : > { %v2008_v37 = vpop.eup %1527  ;;  %1547 = vpow2.f32 %v930_v50  ;;  %v964_v41 = vadd.f32 %v1999_v56, %v963_v32  ;;  %v1002_v39 = vpack.c.bf16 %v2006_v34, %v2001_v60 }
 0x2fa   : > { %v2013_v45 = vpop.eup %1529  ;;  %1549 = vpow2.f32 %v932_v58 }
 0x2fb   : > { %v2018_v49 = vpop.eup %1531  ;;  %1551 = vpow2.f32 %v934_v62  ;;  %v965_v53 = vadd.f32 %v2001_v60, %v964_v41  ;;  %v1003_v51 = vpack.c.bf16 %v2013_v45, %v2008_v37 }
 0x2fc   : > { %v2026_v8 = vpop.eup %1533  ;;  %1553 = vpow2.f32 %v936_v33 }
 0x2fd   : > { %v2031_v57 = vpop.eup %1535  ;;  %1555 = vpow2.f32 %v938_v35  ;;  %v966_v55 = vadd.f32 %v2006_v34, %v965_v53  ;;  %v1004_v10 = vpack.c.bf16 %v2026_v8, %v2018_v49 }
 0x2fe   : > { %v2039_v12 = vpop.eup %1537  ;;  %1557 = vpow2.f32 %v940_v43 }
 0x2ff   : > { %v2044_v61 = vpop.eup %1539  ;;  %1559 = vpow2.f32 %v942_v47  ;;  %v967_v59 = vadd.f32 %v2008_v37, %v966_v55  ;;  %v1005_v14 = vpack.c.bf16 %v2039_v12, %v2031_v57 }
 0x300   : > { %v2052_v16 = vpop.eup %1541  ;;  %1561 = vpow2.f32 %v944_v5 }
 0x301   : > { %v2057_v0 = vpop.eup %1543  ;;  %1563 = vpow2.f32 %v946_v11  ;;  %v968_v1 = vadd.f32 %v2013_v45, %v967_v59  ;;  %v1006_v18 = vpack.c.bf16 %v2052_v16, %v2044_v61  ;;  %v1067_v59 = vld [vmem:[%s2159_s4] sm:$0xff] }
 0x302   : > { %v2065_v20 = vpop.eup %1545  ;;  %1565 = vpow2.f32 %v948_v9 }
 0x303   : > { %v1548_v2 = vpop.eup %1547  ;;  %1567 = vpow2.f32 %v950_v15  ;;  %v969_v23 = vadd.f32 %v2018_v49, %v968_v1  ;;  %v1007_v3 = vpack.c.bf16 %v2065_v20, %v2057_v0  ;;  %v1321_v49 = vcombine.low %v1877_v63, %v1877_v63 }
 0x304   : > { %v1550_v24 = vpop.eup %1549  ;;  %1569 = vpow2.f32 %v952_v13  ;;  %v1639_v63 = vmov 0  }
 0x305   : > { %v1552_v27 = vpop.eup %1551  ;;  %1571 = vpow2.f32 %v954_v19  ;;  %v970_v21 = vadd.f32 %v2026_v8, %v969_v23  ;;  %v1008_v4 = vpack.c.bf16 %v1550_v24, %v1548_v2  ;;  %1512 = vset.pattern.permute.xlu0 %v1639_v63 }
 0x306   : > { %v1554_v29 = vpop.eup %1553  ;;  %1573 = vpow2.f32 %v956_v17  ;;  %1071 = vperm.xlu0 %1512, %v1067_v59  }
 0x307   : > { %v1556_v28 = vpop.eup %1555  ;;  %1575 = vpow2.f32 %v958_v22  ;;  %v971_v6 = vadd.f32 %v2031_v57, %v970_v21  ;;  %1365 = vmatprep.subr.bf16.mxu1 %v1008_v4  ;;  %v1009_v30 = vpack.c.bf16 %v1554_v29, %v1552_v27 }
 0x308   : > { %v1558_v36 = vpop.eup %1557  ;;  %1577 = vpow2.f32 %v960_v25  ;;  %1366 = vmatpush3.bf16.msra.mxu1 %v1000_v54  ;;  %v1066_v25 = vld [vmem:[%s2158_s3 + $0x8] sm:$0xff] }
 0x309   : > { %v1560_v26 = vpop.eup %1559  ;;  %v972_v48 = vadd.f32 %v2039_v12, %v971_v6  ;;  %1367 = vmatprep.subr.bf16.mxu1 %v1009_v30  ;;  %v1010_v7 = vpack.c.bf16 %v1558_v36, %v1556_v28 }
 0x30a   : > { %v1562_v40 = vpop.eup %1561 }
 0x30b   : > { %v1564_v44 = vpop.eup %1563  ;;  %v973_v50 = vadd.f32 %v2044_v61, %v972_v48  ;;  %v1011_v52 = vpack.c.bf16 %v1562_v40, %v1560_v26  ;;  %v1065_v61 = vld [vmem:[%s2158_s3] sm:$0xff] }
 0x30c   : > { %v1566_v58 = vpop.eup %1565  ;;  %1368 = vmatpush3.bf16.msra.mxu1 %v1001_v31 }
 0x30d   : > { %v1568_v62 = vpop.eup %1567  ;;  %v974_v32 = vadd.f32 %v2052_v16, %v973_v50  ;;  %1369 = vmatprep.subr.bf16.mxu1 %v1010_v7  ;;  %v1012_v38 = vpack.c.bf16 %v1566_v58, %v1564_v44 }
 0x30e   : > { %v1570_v42 = vpop.eup %1569 }
 0x30f   : > { %v1572_v54 = vpop.eup %1571  ;;  %v975_v33 = vadd.f32 %v2057_v0, %v974_v32  ;;  %v1013_v35 = vpack.c.bf16 %v1570_v42, %v1568_v62 }
 0x310   : > { %v1574_v41 = vpop.eup %1573  ;;  %1370 = vmatpush3.bf16.msra.mxu1 %v1002_v39 }
 0x311   : > { %v1576_v43 = vpop.eup %1575  ;;  %v976_v47 = vadd.f32 %v2065_v20, %v975_v33  ;;  %1371 = vmatprep.subr.bf16.mxu1 %v1011_v52  ;;  %v1014_v46 = vpack.c.bf16 %v1574_v41, %v1572_v54 }
 0x312   : > { %v1578_v56 = vpop.eup %1577 }
 0x313   : > { %v977_v31 = vadd.f32 %v1548_v2, %v976_v47  ;;  %v1015_v53 = vpack.c.bf16 %v1578_v56, %v1576_v43 }
 0x314   : > { %1372 = vmatpush3.bf16.msra.mxu1 %v1003_v51 }
 0x315   : > { %v978_v5 = vadd.f32 %v1550_v24, %v977_v31  ;;  %1373 = vmatprep.subr.bf16.mxu1 %v1012_v38 }
 0x317   : > { %v979_v11 = vadd.f32 %v1552_v27, %v978_v5 }
 0x318   : > { %1374 = vmatpush3.bf16.msra.mxu1 %v1004_v10 }
 0x319   : > { %v980_v60 = vadd.f32 %v1554_v29, %v979_v11  ;;  %1375 = vmatprep.subr.bf16.mxu1 %v1013_v35 }
 0x31b   : > { %v981_v34 = vadd.f32 %v1556_v28, %v980_v60 }
 0x31c   : > { %1376 = vmatpush3.bf16.msra.mxu1 %v1005_v14  ;;  %v1068_v14 = vld [vmem:[%s2159_s4 + $0x8] sm:$0xff] }
 0x31d   : > { %v982_v39 = vadd.f32 %v1558_v36, %v981_v34  ;;  %1377 = vmatprep.subr.bf16.mxu1 %v1014_v46  ;;  %1076 = vperm.xlu0 %1512, %v1068_v14  }
 0x31f   : > { %v983_v55 = vadd.f32 %v1560_v26, %v982_v39 }
 0x320   : > { %1378 = vmatpush3.bf16.msra.mxu1 %v1006_v18 }
 0x321   : > { %v984_v37 = vadd.f32 %v1562_v40, %v983_v55  ;;  %1379 = vmatprep.subr.bf16.mxu1 %v1015_v53 }
 0x323   : > { %v985_v45 = vadd.f32 %v1564_v44, %v984_v37 }
 0x324   : > { %1380 = vmatpush3.bf16.msra.mxu1 %v1007_v3 }
 0x325   : > { %v986_v51 = vadd.f32 %v1566_v58, %v985_v45 }
 0x327   : > { %v987_v8 = vadd.f32 %v1568_v62, %v986_v51  ;;  %1056 = vmatmul.mubr.bf16.vlgmr.msra.gmra.mrb[0].mxu1 %v1321_v49 }
 0x328   : > { %1442 = vmatprep.mubr.msk.f32.mxu1 %vm507_vm2, %v1065_v61 }
 0x329   : > { %v988_v10 = vadd.f32 %v1570_v42, %v987_v8 }
 0x32b   : > { %v989_v57 = vadd.f32 %v1572_v54, %v988_v10 }
 0x32d   : > { %v990_v12 = vadd.f32 %v1574_v41, %v989_v57 }
 0x32f   : > { %v991_v9 = vadd.f32 %v1576_v43, %v990_v12 }
 0x331   : > { %v992_v15 = vadd.f32 %v1578_v56, %v991_v9 }
 0x333   : > { %v993_v16 = vrot.slane %v992_v15, 4 }
 0x335   : > { %v994_v13 = vadd.f32 %v993_v16, %v992_v15 }
 0x337   : > { %v995_v0 = vrot.slane %v994_v13, 2 }
 0x339   : > { %v996_v19 = vadd.f32 %v995_v0, %v994_v13 }
 0x33b   : > { %v997_v1 = vrot.slane %v996_v19, 1 }
 0x33d   : > { %v998_v18 = vadd.f32 %v997_v1, %v996_v19 }
 0x33f   : > { %1579 = vrcp.f32 %v998_v18 }
 0x349   : > { %v1580_v23 = vpop.eup %1579 }
 0x385   : > { %v1072_v27 = vpop.permute.xlu0 %1071 }
 0x39c   : > { %v1077_v4 = vpop.permute.xlu0 %1076 }
 0x3fa   : > { %v1381_v20 = vpop.f32.mrb[0].mxu1 }
 0x3fb   : > { %v1382_v17 = vpop.f32.mrb[1].mxu1 }
 0x3fc   : > { %v1383_v2 = vadd.f32 %v1382_v17, %v1381_v20  ;;  %v1384_v22 = vpop.f32.mrb[2].mxu1 }
 0x3fd   : > { %v1385_v3 = vpop.f32.mrb[3].mxu1 }
 0x3fe   : > { %v1064_v24 = vmul.f32 %v1580_v23, %v1383_v2 }
 0x400   : > { %1440 = vmatprep.subr.mxu1 %v1064_v24 }
 0x401   : > { %1441 = vmatpush3.msra.mxu1 %v1064_v24 }
 0x402   : > { %1443 = vmatmul.mubr.msk.f32.vlgmr.msra.gmra.mrb[4].mxu1 %vm507_vm2, %v1066_v25 }
 0x4d3   : > { %1168 = sbr.rel (!%p1716_p5) target bundleno = 1250 (0x4e2), region = 48 }
 0x4d5   : > { %v1444_v21 = vpop.f32.mrb[4].mxu1 }
 0x4d6   : > { %v1157_v29 = vadd.f32 %v1444_v21, %v1077_v4  ;;  %v1151_v28 = vpop.f32.mrb[5].mxu1 }
 0x4d7   : > { %v1152_v6 = vadd.f32 %v1151_v28, %v1072_v27 }
 0x4d8   : > { %1161 = vst [vmem:[%s1737_s17 + $0x8] sm:$0xff] %v1157_v29 }
 0x4d9   : > { %1160 = vst [vmem:[%s1737_s17] sm:$0xff] %v1152_v6 }
 0x4df   : > { %v1204_v36 = vld [vmem:[%s1737_s17 + $0x8] sm:$0xff] }
 0x4e0   : > { %v1202_v30 = vld [vmem:[%s1737_s17] sm:$0xff]  ;;  %1205 = vst [vmem:[%s1172_s27 + $0x10] sm:$0xff] %v1204_v36 }
 0x4e1   : > { %1203 = vst [vmem:[%s1172_s27] sm:$0xff] %v1202_v30 }
 0x4e2 PF: > { %s15_s24 = sadd.s32 1, %s1635_s24   ;;  %s2162_s18 = smov %s1615_s19 }
 0x4e3   : > { %p12_p13 = scmp.ge.s32.totalorder %s15_s24, 6   ;;  %s2163_s19 = smov %s1727_s8 }
 0x4e4   : > { %s2164_s20 = smov %s1627_s22  ;;  %s2165_s21 = smov %s1631_s23 }
 0x4e5   : > { %s2166_s22 = smov %s2169_s25  ;;  %s2167_s23 = smov %s2173_s26 }
 0x4e6   :  { %14 = sbr.rel (!%p12_p13) target bundleno = 4 (0x4), region = 114 }

</bundles_post_ra>
